<compile_context>
chip_gen: v5e
topology: v5e:2x2
jax: 0.10.0
libtpu: 0.0.40
codegen_flags: <defaults>
</compile_context>

<pallas_src>
import jax
import jax.numpy as jnp
from jax.experimental import pallas as pl
from jax.experimental.pallas import tpu as pltpu


def _round_up(x, m):
    return ((x + m - 1) // m) * m


def _mlp_kernel(w1_ref, b1_ref, w2_ref, b2_ref, x_ref, o_ref):
    """One batch tile of the 2->3->1 MLP, pure VPU math.

    w1_ref: (6,) f32 SMEM, row-major (in=2, out=3): w1[i, j] == w1_ref[3*i + j]
    b1_ref: (3,) f32 SMEM   w2_ref: (3,) f32 SMEM   b2_ref: (1,) f32 SMEM
    x_ref : (2, s_tile, L) f32 VMEM  (feature, sublane-folded batch, lanes)
    o_ref : (s_tile, L)    f32 VMEM  (lane-dense, no sublane padding)
    """
    x0 = x_ref[0]                    # (s_tile, L)
    x1 = x_ref[1]                    # (s_tile, L)
    acc = None
    for j in range(3):               # unrolled at trace time; 3 hidden units
        h_j = jnp.maximum(x0 * w1_ref[j] + x1 * w1_ref[3 + j] + b1_ref[j], 0.0)
        term = h_j * w2_ref[j]
        acc = term if acc is None else acc + term
    o_ref[...] = (acc + b2_ref[0]).astype(o_ref.dtype)


def simplenet_forward(x, w1, b1, w2, b2, *, lane_width=4096, s_tile_target=128):
    """x: (B, 2) f32; returns (B, 1) f32 (same semantics as the PyTorch module)."""
    B = x.shape[0]

    # Lane width: multiple of 128, never larger than the (rounded-up) batch.
    L = min(_round_up(max(int(lane_width), 128), 128), _round_up(B, 128))
    b_pad = _round_up(B, L)          # pad batch only up to a multiple of L
    S = b_pad // L                   # sublane-folded rows

    # Sublane tile: multiple of 8 (or == S when S <= 8), sized so each grid
    # step moves a few MiB, but always leaving >= 2 grid steps when S > 8 so
    # both v7x TensorCores get work.
    s_tile_target = max(8, _round_up(int(s_tile_target), 8))
    if S <= 8:
        s_tile = S
    else:
        s_tile = min(s_tile_target, _round_up(pl.cdiv(S, 2), 8))

    # Feature-major, sublane-folded view (2, S, L).  pad + transpose + reshape
    # fuse into a single XLA copy; no explicit zero buffer is materialized.
    x_fold = jnp.pad(x, ((0, b_pad - B), (0, 0))).T.reshape(2, S, L)

    # Double-buffered VMEM need: (2*s_tile*L + s_tile*L) * 4B * 2 = 24B/elem.
    vmem_limit = max(32 * 1024 * 1024, 24 * s_tile * L + (4 << 20))

    out_fold = pl.pallas_call(
        _mlp_kernel,
        out_shape=jax.ShapeDtypeStruct((S, L), x.dtype),
        grid=(pl.cdiv(S, s_tile),),          # ragged last block handled by Pallas
        in_specs=[
            pl.BlockSpec(memory_space=pltpu.SMEM),          # w1 flat (6,)
            pl.BlockSpec(memory_space=pltpu.SMEM),          # b1 flat (3,)
            pl.BlockSpec(memory_space=pltpu.SMEM),          # w2 flat (3,)
            pl.BlockSpec(memory_space=pltpu.SMEM),          # b2 flat (1,)
            pl.BlockSpec((2, s_tile, L), lambda i: (0, i, 0)),  # x tile (VMEM)
        ],
        out_specs=pl.BlockSpec((s_tile, L), lambda i: (i, 0)),
        compiler_params=pltpu.CompilerParams(
            dimension_semantics=("parallel",),
            vmem_limit_bytes=vmem_limit),
    )(w1.reshape(-1), b1.reshape(-1), w2.reshape(-1), b2.reshape(-1), x_fold)

    # (S, L) -> (b_pad, 1) is a free contiguous reshape; the [:B] slice drops
    # the padded batch lanes (whose outputs are garbage and must never escape).
    return out_fold.reshape(b_pad, 1)[:B]


def init_params(key):
    """Deterministic init mimicking PyTorch nn.Linear (uniform +-1/sqrt(fan_in)).
    Weights stored as (in_features, out_features) so forward is x @ W + b."""
    k1, k2, k3, k4 = jax.random.split(key, 4)
    bound1 = 1.0 / jnp.sqrt(2.0)   # hidden: fan_in = 2
    bound2 = 1.0 / jnp.sqrt(3.0)   # classifier: fan_in = 3
    w1 = jax.random.uniform(k1, (2, 3), jnp.float32, -bound1, bound1)
    b1 = jax.random.uniform(k2, (3,), jnp.float32, -bound1, bound1)
    w2 = jax.random.uniform(k3, (3, 1), jnp.float32, -bound2, bound2)
    b2 = jax.random.uniform(k4, (1,), jnp.float32, -bound2, bound2)
    return w1, b1, w2, b2


def reference_forward(x, w1, b1, w2, b2):
    h = jnp.maximum(x @ w1 + b1, 0.0)
    return h @ w2 + b2


if __name__ == "__main__":
    key = jax.random.PRNGKey(0)
    kx, kp, kx2 = jax.random.split(key, 3)
    w1, b1, w2, b2 = init_params(kp)

    # Small batch (single folded tile, S == 1).
    batch = 8
    x = jax.random.normal(kx, (batch, 2), jnp.float32)
    out = jax.block_until_ready(simplenet_forward(x, w1, b1, w2, b2))
    ref = reference_forward(x, w1, b1, w2, b2)
    assert out.shape == (batch, 1)
    assert jnp.allclose(out, ref, atol=1e-5, rtol=1e-5)

    # Ragged batch: exercises sublane folding, batch padding, multiple grid
    # steps, and a ragged last block (S = 10 rows, s_tile = 8, grid = 2).
    batch2 = 1200
    x2 = jax.random.normal(kx2, (batch2, 2), jnp.float32)
    out2 = jax.block_until_ready(
        simplenet_forward(x2, w1, b1, w2, b2, lane_width=128, s_tile_target=8))
    ref2 = reference_forward(x2, w1, b1, w2, b2)
    assert out2.shape == (batch2, 1)
    assert jnp.allclose(out2, ref2, atol=1e-5, rtol=1e-5)

    print("KERNEL_OK")
</pallas_src>

<mosaic_0001>
module attributes {stable_mosaic.version = 11 : i64} {
  func.func @_mlp_kernel(%arg0: i32, %arg1: memref<6xf32, #tpu.memory_space<smem>>, %arg2: memref<3xf32, #tpu.memory_space<smem>>, %arg3: memref<3xf32, #tpu.memory_space<smem>>, %arg4: memref<1xf32, #tpu.memory_space<smem>>, %arg5: memref<2x1x128xf32, #tpu.memory_space<vmem>>, %arg6: memref<1x128xf32, #tpu.memory_space<vmem>>) attributes {dimension_semantics = [#tpu.dimension_semantics<parallel>], iteration_bounds = array<i64: 1>, scalar_prefetch = 0 : i64, scratch_operands = 0 : i64, tpu.core_type = #tpu.core_type<tc>, window_params = [{transform_indices = @transform_0, window_bounds = array<i64: 6>}, {transform_indices = @transform_1, window_bounds = array<i64: 3>}, {transform_indices = @transform_2, window_bounds = array<i64: 3>}, {transform_indices = @transform_3, window_bounds = array<i64: 1>}, {transform_indices = @transform_4, window_bounds = array<i64: 2, 1, 128>}, {transform_indices = @transform_5, window_bounds = array<i64: 1, 128>}]} {
    %c0 = arith.constant 0 : index
    %c0_0 = arith.constant 0 : index
    %c0_1 = arith.constant 0 : index
    %0 = vector.load %arg5[%c0, %c0_0, %c0_1] : memref<2x1x128xf32, #tpu.memory_space<vmem>>, vector<1x1x128xf32>
    %1 = vector.shape_cast %0 : vector<1x1x128xf32> to vector<1x128xf32>
    %c1 = arith.constant 1 : index
    %c0_2 = arith.constant 0 : index
    %c0_3 = arith.constant 0 : index
    %2 = vector.load %arg5[%c1, %c0_2, %c0_3] : memref<2x1x128xf32, #tpu.memory_space<vmem>>, vector<1x1x128xf32>
    %3 = vector.shape_cast %2 : vector<1x1x128xf32> to vector<1x128xf32>
    %c0_4 = arith.constant 0 : index
    %4 = memref.load %arg1[%c0_4] : memref<6xf32, #tpu.memory_space<smem>>
    %5 = vector.broadcast %4 : f32 to vector<1x128xf32>
    %6 = arith.mulf %1, %5 : vector<1x128xf32>
    %c3 = arith.constant 3 : index
    %7 = memref.load %arg1[%c3] : memref<6xf32, #tpu.memory_space<smem>>
    %8 = vector.broadcast %7 : f32 to vector<1x128xf32>
    %9 = arith.mulf %3, %8 : vector<1x128xf32>
    %10 = arith.addf %6, %9 : vector<1x128xf32>
    %c0_5 = arith.constant 0 : index
    %11 = memref.load %arg2[%c0_5] : memref<3xf32, #tpu.memory_space<smem>>
    %12 = vector.broadcast %11 : f32 to vector<1x128xf32>
    %13 = arith.addf %10, %12 : vector<1x128xf32>
    %cst = arith.constant 0.000000e+00 : f32
    %14 = vector.broadcast %cst : f32 to vector<1x128xf32>
    %15 = arith.maximumf %13, %14 : vector<1x128xf32>
    %c0_6 = arith.constant 0 : index
    %16 = memref.load %arg3[%c0_6] : memref<3xf32, #tpu.memory_space<smem>>
    %17 = vector.broadcast %16 : f32 to vector<1x128xf32>
    %18 = arith.mulf %15, %17 : vector<1x128xf32>
    %c1_7 = arith.constant 1 : index
    %19 = memref.load %arg1[%c1_7] : memref<6xf32, #tpu.memory_space<smem>>
    %20 = vector.broadcast %19 : f32 to vector<1x128xf32>
    %21 = arith.mulf %1, %20 : vector<1x128xf32>
    %c4 = arith.constant 4 : index
    %22 = memref.load %arg1[%c4] : memref<6xf32, #tpu.memory_space<smem>>
    %23 = vector.broadcast %22 : f32 to vector<1x128xf32>
    %24 = arith.mulf %3, %23 : vector<1x128xf32>
    %25 = arith.addf %21, %24 : vector<1x128xf32>
    %c1_8 = arith.constant 1 : index
    %26 = memref.load %arg2[%c1_8] : memref<3xf32, #tpu.memory_space<smem>>
    %27 = vector.broadcast %26 : f32 to vector<1x128xf32>
    %28 = arith.addf %25, %27 : vector<1x128xf32>
    %cst_9 = arith.constant 0.000000e+00 : f32
    %29 = vector.broadcast %cst_9 : f32 to vector<1x128xf32>
    %30 = arith.maximumf %28, %29 : vector<1x128xf32>
    %c1_10 = arith.constant 1 : index
    %31 = memref.load %arg3[%c1_10] : memref<3xf32, #tpu.memory_space<smem>>
    %32 = vector.broadcast %31 : f32 to vector<1x128xf32>
    %33 = arith.mulf %30, %32 : vector<1x128xf32>
    %34 = arith.addf %18, %33 : vector<1x128xf32>
    %c2 = arith.constant 2 : index
    %35 = memref.load %arg1[%c2] : memref<6xf32, #tpu.memory_space<smem>>
    %36 = vector.broadcast %35 : f32 to vector<1x128xf32>
    %37 = arith.mulf %1, %36 : vector<1x128xf32>
    %c5 = arith.constant 5 : index
    %38 = memref.load %arg1[%c5] : memref<6xf32, #tpu.memory_space<smem>>
    %39 = vector.broadcast %38 : f32 to vector<1x128xf32>
    %40 = arith.mulf %3, %39 : vector<1x128xf32>
    %41 = arith.addf %37, %40 : vector<1x128xf32>
    %c2_11 = arith.constant 2 : index
    %42 = memref.load %arg2[%c2_11] : memref<3xf32, #tpu.memory_space<smem>>
    %43 = vector.broadcast %42 : f32 to vector<1x128xf32>
    %44 = arith.addf %41, %43 : vector<1x128xf32>
    %cst_12 = arith.constant 0.000000e+00 : f32
    %45 = vector.broadcast %cst_12 : f32 to vector<1x128xf32>
    %46 = arith.maximumf %44, %45 : vector<1x128xf32>
    %c2_13 = arith.constant 2 : index
    %47 = memref.load %arg3[%c2_13] : memref<3xf32, #tpu.memory_space<smem>>
    %48 = vector.broadcast %47 : f32 to vector<1x128xf32>
    %49 = arith.mulf %46, %48 : vector<1x128xf32>
    %50 = arith.addf %34, %49 : vector<1x128xf32>
    %c0_14 = arith.constant 0 : index
    %51 = memref.load %arg4[%c0_14] : memref<1xf32, #tpu.memory_space<smem>>
    %52 = vector.broadcast %51 : f32 to vector<1x128xf32>
    %53 = arith.addf %50, %52 : vector<1x128xf32>
    %c0_15 = arith.constant 0 : index
    %c0_16 = arith.constant 0 : index
    %54 = vector.load %arg6[%c0_15, %c0_16] : memref<1x128xf32, #tpu.memory_space<vmem>>, vector<1x128xf32>
    tpu.vector_store %arg6[%c0_15, %c0_16], %53 {strides = array<i32>} : memref<1x128xf32, #tpu.memory_space<vmem>>, vector<1x128xf32>,
    return
  }
  func.func @transform_0(%arg0: i32) -> i32 {
    %c0_i32 = arith.constant 0 : i32
    %c0_i32_0 = arith.constant 0 : i32
    return %c0_i32 : i32
  }
  func.func @transform_1(%arg0: i32) -> i32 {
    %c0_i32 = arith.constant 0 : i32
    %c0_i32_0 = arith.constant 0 : i32
    return %c0_i32 : i32
  }
  func.func @transform_2(%arg0: i32) -> i32 {
    %c0_i32 = arith.constant 0 : i32
    %c0_i32_0 = arith.constant 0 : i32
    return %c0_i32 : i32
  }
  func.func @transform_3(%arg0: i32) -> i32 {
    %c0_i32 = arith.constant 0 : i32
    %c0_i32_0 = arith.constant 0 : i32
    return %c0_i32 : i32
  }
  func.func @transform_4(%arg0: i32) -> (i32, i32, i32) {
    %c0_i32 = arith.constant 0 : i32
    %c0_i32_0 = arith.constant 0 : i32
    %c0_i32_1 = arith.constant 0 : i32
    return %c0_i32, %arg0, %c0_i32_0 : i32, i32, i32
  }
  func.func @transform_5(%arg0: i32) -> (i32, i32) {
    %c0_i32 = arith.constant 0 : i32
    %c0_i32_0 = arith.constant 0 : i32
    return %arg0, %c0_i32 : i32, i32
  }
}

</mosaic_0001>

<bundles_post_ra>
// kernel: tpu_custom_call.1
= control target key start
LH: loop header
LB: loop body
LE: loop exit
PB: predicated region body
PF: predicated region fallthrough
CT: control target
= control target key end

     0   :  { %11 = vsyncpa [#allocation6], 0  ;;  %s269_s0 = inlined_call_operand.vmem [shape: f32[6], index: 0, kind: input, shape index: {}]   ;;  %s270_s1 = inlined_call_operand.hbm [shape: f32[3], index: 1, kind: input, shape index: {}]   ;;  %s271_s2 = inlined_call_operand.hbm [shape: f32[3], index: 2, kind: input, shape index: {}]   ;;  %s272_s3 = inlined_call_operand.<no memory space> [shape: f32[1], index: 3, kind: input, shape index: {}]   ;;  %s273_s4 = inlined_call_operand.vmem [shape: f32[2,1,128], index: 4, kind: input, shape index: {}]   ;;  %s274_s5 = inlined_call_operand.hbm [shape: f32[1,128], index: 5, kind: output, shape index: {}]  }
   0x1   :  { %12 = vsyncpa [#allocation5], 0 }
   0x2   :  { %13 = vsyncpa [#allocation9], 0 }
   0x3   :  { %14 = vsyncpa [#allocation4], 0  ;;  %s20_s20 = sshll.u32 %s269_s0, 4  ;;  %s29_s23 = sshll.u32 %s270_s1, 4  ;;  %s21_s20 = int_to_ptr.vmem [resolvable:$true] %s20_s20  ;;  %s30_s23 = int_to_ptr.hbm [resolvable:$true] %s29_s23 }
   0x4   :  { %s211_s24 = smov [#allocation3]   ;;  %s212_s25 = smov [#allocation7]  }
   0x5   :  { %23 = dma.vmem_to_smem %s21_s20, 16, %s211_s24, [#allocation6]  }
   0x6   :  { %32 = dma.hbm_to_smem %s30_s23, 16, %s212_s25, [#allocation5]  }
   0x7   :  { %s38_s28 = sshll.u32 %s271_s2, 4  ;;  %s213_s29 = smov [#allocation8]   ;;  %s39_s28 = int_to_ptr.hbm [resolvable:$true] %s38_s28 }
   0x8   :  { %41 = dma.hbm_to_smem %s39_s28, 16, %s213_s29, [#allocation9]  }
   0x9   :  { %203 = dma.done.wait [#allocation6], 16  }
   0xa   :  { %204 = vsyncadd [#allocation6], 4294967280 }
   0xb   :  { %205 = dma.done.wait [#allocation5], 16  }
   0xc   :  { %206 = vsyncadd [#allocation5], 4294967280 }
   0xd   :  { %207 = dma.done.wait [#allocation9], 16  }
   0xe   :  { %208 = vsyncadd [#allocation9], 4294967280 }
   0xf   :  { %58 = sfence }
  0x10   :  { %s62_s0 = sld [smem:[#allocation3]]  ;;  %v59_v0 = vld [vmem:[%s273_s4] sm:$0x1]  ;;  %v129_v1 = vld [vmem:[%s273_s4 + $0x1] sm:$0x1]  ;;  %v107_v33 = vstv %s272_s3  ;;  %s214_s19 = smov [#allocation10]  }
  0x11   :  { %s130_s1 = sld [smem:[#allocation3 + $0x3]]  ;;  %s115_s20 = sshll.u32 %s214_s19, 4  ;;  %s116_s20 = int_to_ptr.vmem [resolvable:$true] %s115_s20 }
  0x12   :  { %s69_s30 = sld [smem:[#allocation7]]  ;;  %s117_s23 = sshll.u32 %s274_s5, 4  ;;  %s118_s23 = int_to_ptr.hbm [resolvable:$true] %s117_s23 }
  0x13   :  { %s254_s6 = sld [smem:[#allocation8]] }
  0x14   :  { %s131_s2 = sld [smem:[#allocation3 + $0x1]] }
  0x15   :  { %s132_s11 = sld [smem:[#allocation3 + $0x4]] }
  0x16   :  { %v63_v2 = vstv %s62_s0  ;;  %s133_s12 = sld [smem:[#allocation7 + $0x1]] }
  0x17   :  { %v64_v3 = vmul.f32 %v63_v2, %v59_v0  ;;  %v66_v4 = vstv %s130_s1  ;;  %s134_s13 = sld [smem:[#allocation8 + $0x1]] }
  0x18   :  { %v67_v5 = vmul.f32 %v129_v1, %v66_v4  ;;  %s135_s14 = sld [smem:[#allocation3 + $0x2]]  ;;  %v70_v6 = vstv %s69_s30 }
  0x19   :  { %s136_s15 = sld [smem:[#allocation3 + $0x5]]  ;;  %v74_v17 = vstv %s254_s6 }
  0x1a   :  { %v68_v7 = vadd.f32 %v67_v5, %v64_v3  ;;  %v77_v8 = vstv %s131_s2  ;;  %s137_s16 = sld [smem:[#allocation7 + $0x2]] }
  0x1b   :  { %v78_v9 = vmul.f32 %v77_v8, %v59_v0  ;;  %v80_v10 = vstv %s132_s11  ;;  %s138_s4 = sld [smem:[#allocation8 + $0x2]] }
  0x1c   :  { %v71_v11 = vadd.f32 %v70_v6, %v68_v7  ;;  %v81_v12 = vmul.f32 %v129_v1, %v80_v10  ;;  %v84_v13 = vstv %s133_s12 }
  0x1d   :  { %v88_v22 = vstv %s134_s13 }
  0x1e   :  { %v72_v14 = vmax.f32 %v71_v11, 0.0  ;;  %v82_v15 = vadd.f32 %v81_v12, %v78_v9  ;;  %v92_v16 = vstv %s135_s14 }
  0x1f   :  { %v93_v18 = vmul.f32 %v92_v16, %v59_v0  ;;  %v95_v19 = vstv %s136_s15 }
  0x20   :  { %v85_v20 = vadd.f32 %v84_v13, %v82_v15  ;;  %v96_v21 = vmul.f32 %v129_v1, %v95_v19  ;;  %v99_v23 = vstv %s137_s16  ;;  %v75_v24 = vmul.f32 %v74_v17, %v72_v14 }
  0x21   :  { %v103_v29 = vstv %s138_s4 }
  0x22   :  { %v86_v25 = vmax.f32 %v85_v20, 0.0  ;;  %v97_v26 = vadd.f32 %v96_v21, %v93_v18 }
  0x24   :  { %v89_v27 = vmul.f32 %v88_v22, %v86_v25  ;;  %v100_v28 = vadd.f32 %v99_v23, %v97_v26 }
  0x26   :  { %v90_v30 = vadd.f32 %v89_v27, %v75_v24  ;;  %v101_v31 = vmax.f32 %v100_v28, 0.0 }
  0x28   :  { %v104_v32 = vmul.f32 %v103_v29, %v101_v31 }
  0x2a   :  { %v105_v34 = vadd.f32 %v104_v32, %v90_v30 }
  0x2c   :  { %v108_v35 = vadd.f32 %v107_v33, %v105_v34 }
  0x2e   :  { %109 = vst [vmem:[#allocation10] sm:$0x1] %v108_v35 }
  0x2f   :  { %120 = dma.vmem_to_hbm [thread:$0]  %s116_s20, 16, %s118_s23, [#allocation4]  }
  0x30   :  { %209 = dma.done.wait [#allocation4], 16  }
  0x31   :  { %210 = vsyncadd [#allocation4], 4294967280 }
  0x32   :  { %125 = vsyncpa [#allocation4], 1 }
  0x33   :  { %126 = vsyncpa [#allocation5], 1 }
  0x34   :  { %127 = vsyncpa [#allocation9], 1 }
  0x35   :  { %128 = vsyncpa [#allocation6], 1 }

</bundles_post_ra>
